<compile_context>
chip_gen: v6e
topology: v6e:2x2x1
jax: 0.10.0
libtpu: 0.0.40
codegen_flags: <defaults>
</compile_context>

<pallas_src>
import functools

import jax
import jax.numpy as jnp
from jax.experimental import pallas as pl
from jax.experimental.pallas import tpu as pltpu


def _round_up(x: int, m: int) -> int:
    return ((x + m - 1) // m) * m


def _fused_mlp_kernel(*refs, n_layers: int, w_dtypes):
    # refs = (x_ref, w0_ref, b0_ref, w1_ref, b1_ref, ..., o_ref)
    x_ref = refs[0]
    o_ref = refs[-1]
    h = x_ref[...]
    for i in range(n_layers):
        w = refs[1 + 2 * i][...]          # (in_pad_i, out_pad_i), pre-transposed
        b = refs[2 + 2 * i][...]          # (1, out_pad_i), f32
        # Cast the activation to the weight dtype (e.g. bf16) so the MXU runs at
        # its fast rate; accumulate in f32.
        lhs = h if h.dtype == w_dtypes[i] else h.astype(w_dtypes[i])
        acc = jnp.dot(lhs, w, preferred_element_type=jnp.float32) + b
        if i < n_layers - 1:
            # ReLU on the f32 accumulator, then immediately downcast to the next
            # layer's weight dtype so the inter-layer temporary is half-width.
            h = jnp.maximum(acc, 0.0).astype(w_dtypes[i + 1])
        else:
            h = acc
    o_ref[...] = h.astype(o_ref.dtype)


def fused_mlp_pallas(x, padded_params, out_pad):
    """Run the whole MLP in one Pallas kernel.

    x:             (B, in_size) activations, unpadded.
    padded_params: list of (w_t, b) with w_t (in_pad_i, out_pad_i) pre-transposed
                   and zero-padded, b (1, out_pad_i) zero-padded, built at init.
    out_pad:       padded width of the last layer (multiple of 128).
    """
    B, IN = x.shape
    itemsize = x.dtype.itemsize
    n_layers = len(padded_params)

    # ---- Batch tiling -------------------------------------------------------
    B8 = _round_up(B, 8)
    if B8 < 16:
        tb = B8                                   # too small to split
    elif B8 <= 1024:
        # At least two tiles so the "parallel" axis feeds both v7x TensorCores;
        # costs one extra ~0.35us grid step, buys up to ~2x when compute-bound.
        tb = min(512, _round_up(-(-B8 // 2), 8))
    else:
        # Large batch: 512-row tiles (~85% of HBM roofline on v6e measurements;
        # still small enough for v7x's 64 MiB VMEM with single-buffered weights).
        tb = 512

    # Only a cheap sublane pad (<=7 rows). The grid uses cdiv, so no full
    # tile-sized copy of x is made when B is not a multiple of tb: the ragged
    # last tile is handled by Pallas (OOB reads ignored row-wise, OOB writes
    # discarded).
    if B8 != B:
        x = jnp.pad(x, ((0, B8 - B), (0, 0)))
    grid = ((B8 + tb - 1) // tb,)

    # ---- VMEM budget --------------------------------------------------------
    w_bytes = sum(int(w.size) * w.dtype.itemsize + int(b.size) * b.dtype.itemsize
                  for w, b in padded_params)
    max_w = max(int(w.shape[1]) for w, _ in padded_params)
    need = (w_bytes                         # weights/biases, single-buffered
            + 2 * tb * IN * itemsize        # double-buffered input tile
            + 2 * tb * out_pad * itemsize   # double-buffered output tile
            + 4 * tb * max_w * 4)           # f32 accumulators / temporaries
    # Floor at 32 MiB (>= all defaults, safe on every generation); cap at
    # 100 MiB (v5e/v6e physical is 128 MiB; anything above v7x's 64 MiB would
    # need the weight-streaming TODO below anyway).
    vmem_limit = int(min(max(int(need * 1.25), 32 * 1024 * 1024),
                         100 * 1024 * 1024))

    # ---- Cost estimate for the XLA scheduler -------------------------------
    flops = sum(2 * B8 * int(w.shape[0]) * int(w.shape[1])
                for w, _ in padded_params)
    bytes_accessed = B8 * IN * itemsize + B8 * out_pad * itemsize + w_bytes
    cost = pl.CostEstimate(flops=int(flops), transcendentals=0,
                           bytes_accessed=int(bytes_accessed))

    # ---- Specs --------------------------------------------------------------
    flat_params = []
    in_specs = [pl.BlockSpec((tb, IN), lambda i: (i, 0))]
    const_map = lambda i: (0, 0)
    for w_t, b in padded_params:
        flat_params.extend([w_t, b])
        # Grid-invariant blocks: single buffer is enough (never re-fetched),
        # halving the VMEM cost of keeping every layer's weights resident.
        in_specs.append(pl.BlockSpec(w_t.shape, const_map,
                                     pipeline_mode=pl.Buffered(buffer_count=1)))
        in_specs.append(pl.BlockSpec(b.shape, const_map,
                                     pipeline_mode=pl.Buffered(buffer_count=1)))

    kernel = functools.partial(
        _fused_mlp_kernel, n_layers=n_layers,
        w_dtypes=tuple(w.dtype for w, _ in padded_params))

    out = pl.pallas_call(
        kernel,
        out_shape=jax.ShapeDtypeStruct((B8, out_pad), x.dtype),
        grid=grid,
        in_specs=in_specs,
        out_specs=pl.BlockSpec((tb, out_pad), lambda i: (i, 0)),
        compiler_params=pltpu.CompilerParams(
            dimension_semantics=("parallel",),
            vmem_limit_bytes=vmem_limit),
        cost_estimate=cost,
    )(x, *flat_params)
    return out[:B]


class MLPPallas:
    """JAX/Pallas equivalent of the PyTorch MLP module (fused forward).

    param_dtype defaults to float32 for strict parity with the PyTorch
    reference; pass jnp.bfloat16 for production (half the weight HBM traffic
    and VMEM residency, full-rate MXU; accumulation stays f32).
    """

    def __init__(self, in_size, hidden_sizes, out_size, key,
                 param_dtype=jnp.float32):
        sizes = [in_size] + list(hidden_sizes) + [out_size]
        self.in_size = in_size
        self.out_size = out_size

        # Raw params in the PyTorch nn.Linear layout (out_features, in_features),
        # init U(-1/sqrt(fan_in), 1/sqrt(fan_in)) like torch defaults.
        self.params = []
        for fan_in, fan_out in zip(sizes[:-1], sizes[1:]):
            key, wk, bk = jax.random.split(key, 3)
            bound = 1.0 / (fan_in ** 0.5)
            w = jax.random.uniform(wk, (fan_out, fan_in), jnp.float32, -bound, bound)
            b = jax.random.uniform(bk, (fan_out,), jnp.float32, -bound, bound)
            self.params.append((w, b))

        # Kernel-facing params: transposed to (in, out) and zero-padded so every
        # layer's output (lane) width is a multiple of 128. Done ONCE here so
        # the forward path has zero per-call transpose/pad ops. Zero padding is
        # exact: padded lanes carry 0 through matmul, bias and ReLU.
        # The first layer's K (= in_size) is left unpadded; if in_size is an
        # awkward width, pad x's feature dim to a 128-multiple in the producer.
        self.padded_params = []
        prev_pad = in_size
        for (w, b) in self.params:
            out_f, in_f = w.shape
            out_p = _round_up(out_f, 128)
            w_t = jnp.zeros((prev_pad, out_p), param_dtype)
            w_t = w_t.at[:in_f, :out_f].set(w.T.astype(param_dtype))
            b_p = jnp.zeros((1, out_p), jnp.float32).at[0, :out_f].set(b)
            self.padded_params.append((w_t, b_p))
            prev_pad = out_p
        self.out_pad = prev_pad
        # TODO(synk): for MLPs whose total weight bytes approach v7x's 64 MiB
        # VMEM, stream weights layer-by-layer (memory_space=pl.ANY +
        # pltpu.make_async_copy double-buffering, prefetch layer k+1 during
        # layer k's matmul) instead of keeping all layers resident.

    def __call__(self, x):
        y = fused_mlp_pallas(x, self.padded_params, self.out_pad)
        return y[:, :self.out_size]


def _ref_forward(x, params, cast=None):
    """Plain-JAX reference (torch-layout weights). If cast is given, emulate the
    low-precision weight/activation path (f32 accumulation) of the kernel."""
    h = x
    n = len(params)
    for i, (w, b) in enumerate(params):
        lhs = h if cast is None else h.astype(cast)
        rhs = w.T if cast is None else w.T.astype(cast)
        h = jnp.dot(lhs, rhs, preferred_element_type=jnp.float32) + b
        if i < n - 1:
            h = jnp.maximum(h, 0.0)
    return h


if __name__ == "__main__":
    key = jax.random.PRNGKey(0)
    key, xk, pk, x2k, x3k = jax.random.split(key, 5)

    batch = 8
    in_size = 32
    hidden_sizes = [64, 48]
    out_size = 16

    x = jax.random.normal(xk, (batch, in_size), jnp.float32)

    # f32 weights: strict parity with the PyTorch module.
    mlp = MLPPallas(in_size, hidden_sizes, out_size, pk)
    y = jax.block_until_ready(mlp(x))
    ref = _ref_forward(x, mlp.params)
    assert y.shape == (batch, out_size)
    assert jnp.allclose(y, ref, atol=1e-4, rtol=1e-4)

    # Batch that needs sublane padding.
    x2 = jax.random.normal(x2k, (5, in_size), jnp.float32)
    y2 = jax.block_until_ready(mlp(x2))
    ref2 = _ref_forward(x2, mlp.params)
    assert y2.shape == (5, out_size)
    assert jnp.allclose(y2, ref2, atol=1e-4, rtol=1e-4)

    # Multi-tile batch: splits into >=2 "parallel" grid steps (v7x dual-TC path)
    # with a ragged last tile (no full-tile padding of x).
    x3 = jax.random.normal(x3k, (40, in_size), jnp.float32)
    y3 = jax.block_until_ready(mlp(x3))
    ref3 = _ref_forward(x3, mlp.params)
    assert y3.shape == (40, out_size)
    assert jnp.allclose(y3, ref3, atol=1e-4, rtol=1e-4)

    # bf16 weight path (recommended production setting), checked against an
    # emulated-bf16 reference with f32 accumulation.
    mlp_bf16 = MLPPallas(in_size, hidden_sizes, out_size, pk,
                         param_dtype=jnp.bfloat16)
    y4 = jax.block_until_ready(mlp_bf16(x))
    ref4 = _ref_forward(x, mlp_bf16.params, cast=jnp.bfloat16)
    assert y4.shape == (batch, out_size)
    assert jnp.allclose(y4, ref4, atol=1e-3, rtol=1e-3)

    print("KERNEL_OK")
</pallas_src>

<mosaic_0001>
module attributes {stable_mosaic.version = 11 : i64} {
  func.func @_fused_mlp_kernel(%arg0: i32, %arg1: memref<8x32xf32, #tpu.memory_space<vmem>>, %arg2: memref<32x128xf32, #tpu.memory_space<vmem>>, %arg3: memref<1x128xf32, #tpu.memory_space<vmem>>, %arg4: memref<128x128xf32, #tpu.memory_space<vmem>>, %arg5: memref<1x128xf32, #tpu.memory_space<vmem>>, %arg6: memref<128x128xf32, #tpu.memory_space<vmem>>, %arg7: memref<1x128xf32, #tpu.memory_space<vmem>>, %arg8: memref<8x128xf32, #tpu.memory_space<vmem>>) attributes {dimension_semantics = [#tpu.dimension_semantics<parallel>], iteration_bounds = array<i64: 1>, scalar_prefetch = 0 : i64, scratch_operands = 0 : i64, tpu.core_type = #tpu.core_type<tc>, window_params = [{transform_indices = @transform_0, window_bounds = array<i64: 8, 32>}, {pipeline_mode = #tpu.pipeline_mode<synchronous>, transform_indices = @transform_1, window_bounds = array<i64: 32, 128>}, {pipeline_mode = #tpu.pipeline_mode<synchronous>, transform_indices = @transform_2, window_bounds = array<i64: 1, 128>}, {pipeline_mode = #tpu.pipeline_mode<synchronous>, transform_indices = @transform_3, window_bounds = array<i64: 128, 128>}, {pipeline_mode = #tpu.pipeline_mode<synchronous>, transform_indices = @transform_4, window_bounds = array<i64: 1, 128>}, {pipeline_mode = #tpu.pipeline_mode<synchronous>, transform_indices = @transform_5, window_bounds = array<i64: 128, 128>}, {pipeline_mode = #tpu.pipeline_mode<synchronous>, transform_indices = @transform_6, window_bounds = array<i64: 1, 128>}, {transform_indices = @transform_7, window_bounds = array<i64: 8, 128>}]} {
    %c0 = arith.constant 0 : index
    %c0_0 = arith.constant 0 : index
    %0 = vector.load %arg1[%c0, %c0_0] : memref<8x32xf32, #tpu.memory_space<vmem>>, vector<8x32xf32>
    %c0_1 = arith.constant 0 : index
    %c0_2 = arith.constant 0 : index
    %1 = vector.load %arg2[%c0_1, %c0_2] : memref<32x128xf32, #tpu.memory_space<vmem>>, vector<32x128xf32>
    %c0_3 = arith.constant 0 : index
    %c0_4 = arith.constant 0 : index
    %2 = vector.load %arg3[%c0_3, %c0_4] : memref<1x128xf32, #tpu.memory_space<vmem>>, vector<1x128xf32>
    %cst = arith.constant dense<0.000000e+00> : vector<8x128xf32>
    %3 = tpu.matmul %0, %1, %cst {dimension_numbers = #tpu.dot_dimension_numbers<[1], [0], [0], [1], [0, 0, 1, 1], [], []>} : vector<8x32xf32>, vector<32x128xf32>, vector<8x128xf32> -> vector<8x128xf32>
    %4 = vector.broadcast %2 : vector<1x128xf32> to vector<8x128xf32>
    %5 = arith.addf %3, %4 : vector<8x128xf32>
    %cst_5 = arith.constant 0.000000e+00 : f32
    %6 = vector.broadcast %cst_5 : f32 to vector<8x128xf32>
    %7 = arith.maximumf %5, %6 : vector<8x128xf32>
    %c0_6 = arith.constant 0 : index
    %c0_7 = arith.constant 0 : index
    %8 = vector.load %arg4[%c0_6, %c0_7] : memref<128x128xf32, #tpu.memory_space<vmem>>, vector<128x128xf32>
    %c0_8 = arith.constant 0 : index
    %c0_9 = arith.constant 0 : index
    %9 = vector.load %arg5[%c0_8, %c0_9] : memref<1x128xf32, #tpu.memory_space<vmem>>, vector<1x128xf32>
    %cst_10 = arith.constant dense<0.000000e+00> : vector<8x128xf32>
    %10 = tpu.matmul %7, %8, %cst_10 {dimension_numbers = #tpu.dot_dimension_numbers<[1], [0], [0], [1], [0, 0, 1, 1], [], []>} : vector<8x128xf32>, vector<128x128xf32>, vector<8x128xf32> -> vector<8x128xf32>
    %11 = vector.broadcast %9 : vector<1x128xf32> to vector<8x128xf32>
    %12 = arith.addf %10, %11 : vector<8x128xf32>
    %cst_11 = arith.constant 0.000000e+00 : f32
    %13 = vector.broadcast %cst_11 : f32 to vector<8x128xf32>
    %14 = arith.maximumf %12, %13 : vector<8x128xf32>
    %c0_12 = arith.constant 0 : index
    %c0_13 = arith.constant 0 : index
    %15 = vector.load %arg6[%c0_12, %c0_13] : memref<128x128xf32, #tpu.memory_space<vmem>>, vector<128x128xf32>
    %c0_14 = arith.constant 0 : index
    %c0_15 = arith.constant 0 : index
    %16 = vector.load %arg7[%c0_14, %c0_15] : memref<1x128xf32, #tpu.memory_space<vmem>>, vector<1x128xf32>
    %cst_16 = arith.constant dense<0.000000e+00> : vector<8x128xf32>
    %17 = tpu.matmul %14, %15, %cst_16 {dimension_numbers = #tpu.dot_dimension_numbers<[1], [0], [0], [1], [0, 0, 1, 1], [], []>} : vector<8x128xf32>, vector<128x128xf32>, vector<8x128xf32> -> vector<8x128xf32>
    %18 = vector.broadcast %16 : vector<1x128xf32> to vector<8x128xf32>
    %19 = arith.addf %17, %18 : vector<8x128xf32>
    %c0_17 = arith.constant 0 : index
    %c0_18 = arith.constant 0 : index
    %20 = vector.load %arg8[%c0_17, %c0_18] : memref<8x128xf32, #tpu.memory_space<vmem>>, vector<8x128xf32>
    tpu.vector_store %arg8[%c0_17, %c0_18], %19 {strides = array<i32>} : memref<8x128xf32, #tpu.memory_space<vmem>>, vector<8x128xf32>,
    return
  }
  func.func @transform_0(%arg0: i32) -> (i32, i32) {
    %c0_i32 = arith.constant 0 : i32
    %c0_i32_0 = arith.constant 0 : i32
    return %arg0, %c0_i32 : i32, i32
  }
  func.func @transform_1(%arg0: i32) -> (i32, i32) {
    %c0_i32 = arith.constant 0 : i32
    %c0_i32_0 = arith.constant 0 : i32
    %c0_i32_1 = arith.constant 0 : i32
    return %c0_i32, %c0_i32_0 : i32, i32
  }
  func.func @transform_2(%arg0: i32) -> (i32, i32) {
    %c0_i32 = arith.constant 0 : i32
    %c0_i32_0 = arith.constant 0 : i32
    %c0_i32_1 = arith.constant 0 : i32
    return %c0_i32, %c0_i32_0 : i32, i32
  }
  func.func @transform_3(%arg0: i32) -> (i32, i32) {
    %c0_i32 = arith.constant 0 : i32
    %c0_i32_0 = arith.constant 0 : i32
    %c0_i32_1 = arith.constant 0 : i32
    return %c0_i32, %c0_i32_0 : i32, i32
  }
  func.func @transform_4(%arg0: i32) -> (i32, i32) {
    %c0_i32 = arith.constant 0 : i32
    %c0_i32_0 = arith.constant 0 : i32
    %c0_i32_1 = arith.constant 0 : i32
    return %c0_i32, %c0_i32_0 : i32, i32
  }
  func.func @transform_5(%arg0: i32) -> (i32, i32) {
    %c0_i32 = arith.constant 0 : i32
    %c0_i32_0 = arith.constant 0 : i32
    %c0_i32_1 = arith.constant 0 : i32
    return %c0_i32, %c0_i32_0 : i32, i32
  }
  func.func @transform_6(%arg0: i32) -> (i32, i32) {
    %c0_i32 = arith.constant 0 : i32
    %c0_i32_0 = arith.constant 0 : i32
    %c0_i32_1 = arith.constant 0 : i32
    return %c0_i32, %c0_i32_0 : i32, i32
  }
  func.func @transform_7(%arg0: i32) -> (i32, i32) {
    %c0_i32 = arith.constant 0 : i32
    %c0_i32_0 = arith.constant 0 : i32
    return %arg0, %c0_i32 : i32, i32
  }
}

</mosaic_0001>

<bundles_post_ra>
// kernel: tpu_custom_call.1
= control target key start
LH: loop header
LB: loop body
LE: loop exit
PB: predicated region body
PF: predicated region fallthrough
CT: control target
= control target key end

     0   :  { %12 = vsyncpa [#allocation3], 0  ;;  %s737_s0 = inlined_call_operand.hbm [shape: f32[8,32], index: 0, kind: input, shape index: {}]   ;;  %s738_s1 = inlined_call_operand.hbm [shape: f32[32,128], index: 1, kind: input, shape index: {}]   ;;  %s739_s2 = inlined_call_operand.vmem [shape: f32[1,128], index: 2, kind: input, shape index: {}]   ;;  %s740_s3 = inlined_call_operand.hbm [shape: f32[128,128], index: 3, kind: input, shape index: {}]   ;;  %s741_s4 = inlined_call_operand.vmem [shape: f32[1,128], index: 4, kind: input, shape index: {}]   ;;  %s742_s5 = inlined_call_operand.hbm [shape: f32[128,128], index: 5, kind: input, shape index: {}]   ;;  %s743_s6 = inlined_call_operand.vmem [shape: f32[1,128], index: 6, kind: input, shape index: {}]   ;;  %s744_s7 = inlined_call_operand.hbm [shape: f32[8,128], index: 7, kind: output, shape index: {}]  }
   0x1   :  { %13 = vsyncpa [#allocation6], 0 }
   0x2   :  { %14 = vsyncpa [#allocation9], 0 }
   0x3   :  { %15 = vsyncpa [#allocation4], 0  ;;  %s613_s24 = smov [#allocation5]  }
   0x4   :  { %s31_s25 = sshll.u32 %s613_s24, 4  ;;  %s32_s25 = int_to_ptr.vmem [resolvable:$true] %s31_s25 }
   0x5   :  { %s513_s26 = scalar_lea.vmem %s32_s25, 512  ;;  %p518_p1 = scmp.lt.s32.totalorder %s32_s25, %s32_s25 }
   0x6   :  { %p514_p0 = scmp.ne.s32.totalorder %s32_s25, %s513_s26  ;;  %p519_p2 = scmp.lt.s32.totalorder %s513_s26, %s513_s26 }
   0x8   :  { %p520_p3 = por %p519_p2, %p518_p1 }
   0xa   :  { %p521_p4 = pnand %p520_p3, %p514_p0 }
   0xc   :  { %524 = shalt.err (!%p521_p4)
}
   0xd   :  { %s614_s27 = smov 128   ;;  %s615_s28 = smov 8  }
   0xe   :  { %37 = dma.hbm_to_vmem [thread:$0]  %s738_s1, 512, %s32_s25, [#allocation6], %s614_s27, %s614_s27, %s615_s28  }
   0xf   :  { %s616_s8 = smov [#allocation2]   ;;  %s617_s10 = smov [#allocation7]  }
  0x10   :  { %s22_s9 = sshll.u32 %s616_s8, 4  ;;  %s45_s11 = sshll.u32 %s617_s10, 4  ;;  %s23_s9 = int_to_ptr.vmem [resolvable:$true] %s22_s9  ;;  %s46_s11 = int_to_ptr.vmem [resolvable:$true] %s45_s11 }
  0x11   :  { %s533_s12 = scalar_lea.vmem %s23_s9, 128  ;;  %p538_p6 = scmp.lt.s32.totalorder %s23_s9, %s23_s9 }
  0x12   :  { %p534_p5 = scmp.ne.s32.totalorder %s23_s9, %s533_s12  ;;  %p539_p7 = scmp.lt.s32.totalorder %s533_s12, %s533_s12 }
  0x14   :  { %p540_p8 = por %p539_p7, %p538_p6 }
  0x16   :  { %p541_p9 = pnand %p540_p8, %p534_p5 }
  0x18   :  { %544 = shalt.err (!%p541_p9)
}
  0x19   :  { %25 = dma.hbm_to_vmem [thread:$0]  %s737_s0, 128, %s23_s9, [#allocation3]  }
  0x1a   :  { %s553_s15 = scalar_lea.vmem %s46_s11, 2048  ;;  %p558_p11 = scmp.lt.s32.totalorder %s46_s11, %s46_s11 }
  0x1b   :  { %p554_p10 = scmp.ne.s32.totalorder %s46_s11, %s553_s15  ;;  %p559_p12 = scmp.lt.s32.totalorder %s553_s15, %s553_s15 }
  0x1d   :  { %p560_p13 = por %p559_p12, %p558_p11 }
  0x1f   :  { %p561_p0 = pnand %p560_p13, %p554_p10 }
  0x21   :  { %564 = shalt.err (!%p561_p0)
}
  0x22   :  { %51 = dma.hbm_to_vmem [thread:$0]  %s740_s3, 2048, %s46_s11, [#allocation6], %s614_s27, %s614_s27, %s615_s28  }
  0x23   :  { %s618_s17 = smov [#allocation8]  }
  0x24   :  { %s59_s18 = sshll.u32 %s618_s17, 4  ;;  %s60_s18 = int_to_ptr.vmem [resolvable:$true] %s59_s18 }
  0x25   :  { %s573_s19 = scalar_lea.vmem %s60_s18, 2048  ;;  %p578_p2 = scmp.lt.s32.totalorder %s60_s18, %s60_s18 }
  0x26   :  { %p574_p1 = scmp.ne.s32.totalorder %s60_s18, %s573_s19  ;;  %p579_p3 = scmp.lt.s32.totalorder %s573_s19, %s573_s19 }
  0x28   :  { %p580_p4 = por %p579_p3, %p578_p2 }
  0x2a   :  { %p581_p5 = pnand %p580_p4, %p574_p1 }
  0x2c   :  { %584 = shalt.err (!%p581_p5)
}
  0x2d   :  { %65 = dma.hbm_to_vmem [thread:$0]  %s742_s5, 2048, %s60_s18, [#allocation9], %s614_s27, %s614_s27, %s615_s28  }
  0x2e   :  { %605 = dma.done.wait [#allocation3], 128  }
  0x2f   :  { %606 = vsyncadd [#allocation3], 4294967168 }
  0x30   :  { %607 = dma.done.wait [#allocation6], 2560  }
  0x31   :  { %608 = vsyncadd [#allocation6], 4294964736 }
  0x32   :  { %609 = dma.done.wait [#allocation9], 2048  }
  0x33   :  { %610 = vsyncadd [#allocation9], 4294965248  ;;  %v619_v0 = vmov 0.0   ;;  %vm620_vm0 = vmmov 0   ;;  %v84_v1 = vld [vmem:[#allocation5 + $0x18] sm:$0xff]  ;;  %v83_v2 = vld [vmem:[#allocation5 + $0x10] sm:$0xff] }
  0x34   :  { %415 = vmatprep.subr.mxu0 %v619_v0  ;;  %423 = vmatprep.mubr.msk.f32.mxu0 %vm620_vm0, %v619_v0  ;;  %v182_v3 = vld [vmem:[#allocation7 + $0x78] sm:$0xff]  ;;  %v82_v4 = vld [vmem:[#allocation5 + $0x8] sm:$0xff]  ;;  %v181_v5 = vld [vmem:[#allocation7 + $0x70] sm:$0xff]  ;;  %vm92_vm1 = vcmask 261120   ;;  %s621_s24 = smov [#allocation10]  }
  0x35   :  { %426 = vmatprep.subr.mxu1 %v619_v0  ;;  %458 = vmatprep.mubr.msk.f32.mxu1 %vm620_vm0, %v619_v0  ;;  %v180_v6 = vld [vmem:[#allocation7 + $0x68] sm:$0xff]  ;;  %v81_v7 = vld [vmem:[#allocation5] sm:$0xff]  ;;  %v80_v8 = vld [vmem:[#allocation2] sm:$0xff]  ;;  %s361_s25 = sshll.u32 %s621_s24, 4  ;;  %s362_s25 = int_to_ptr.vmem [resolvable:$true] %s361_s25 }
  0x36   :  { %416 = vmatpush3.msra.mxu0 %v84_v1  ;;  %427 = vmatpush3.msra.mxu1 %v182_v3  ;;  %v179_v9 = vld [vmem:[#allocation7 + $0x60] sm:$0xff]  ;;  %v178_v10 = vld [vmem:[#allocation7 + $0x58] sm:$0xff]  ;;  %v177_v11 = vld [vmem:[#allocation7 + $0x50] sm:$0xff]  ;;  %s585_s26 = scalar_lea.vmem %s362_s25, 128  ;;  %p590_p7 = scmp.lt.s32.totalorder %s362_s25, %s362_s25 }
  0x37   :  { %417 = vmatprep.subr.mxu0 %v619_v0  ;;  %428 = vmatprep.subr.mxu1 %v619_v0  ;;  %v176_v12 = vld [vmem:[#allocation7 + $0x48] sm:$0xff]  ;;  %v175_v13 = vld [vmem:[#allocation7 + $0x40] sm:$0xff]  ;;  %v174_v14 = vld [vmem:[#allocation7 + $0x38] sm:$0xff]  ;;  %p586_p6 = scmp.ne.s32.totalorder %s362_s25, %s585_s26  ;;  %p591_p8 = scmp.lt.s32.totalorder %s585_s26, %s585_s26 }
  0x38   :  { %418 = vmatpush3.msra.mxu0 %v83_v2  ;;  %429 = vmatpush3.msra.mxu1 %v181_v5  ;;  %v173_v15 = vld [vmem:[#allocation7 + $0x30] sm:$0xff]  ;;  %v172_v16 = vld [vmem:[#allocation7 + $0x28] sm:$0xff]  ;;  %v171_v17 = vld [vmem:[#allocation7 + $0x20] sm:$0xff] }
  0x39   :  { %419 = vmatprep.subr.mxu0 %v619_v0  ;;  %430 = vmatprep.subr.mxu1 %v619_v0  ;;  %v170_v18 = vld [vmem:[#allocation7 + $0x18] sm:$0xff]  ;;  %v169_v19 = vld [vmem:[#allocation7 + $0x10] sm:$0xff]  ;;  %v168_v20 = vld [vmem:[#allocation7 + $0x8] sm:$0xff]  ;;  %p592_p9 = por %p591_p8, %p590_p7 }
  0x3a   :  { %420 = vmatpush3.msra.mxu0 %v82_v4  ;;  %431 = vmatpush3.msra.mxu1 %v180_v6  ;;  %v167_v21 = vld [vmem:[#allocation7] sm:$0xff]  ;;  %v276_v22 = vld [vmem:[#allocation8 + $0x78] sm:$0xff]  ;;  %v275_v23 = vld [vmem:[#allocation8 + $0x70] sm:$0xff] }
  0x3b   :  { %421 = vmatprep.subr.mxu0 %v619_v0  ;;  %432 = vmatprep.subr.mxu1 %v619_v0  ;;  %v274_v24 = vld [vmem:[#allocation8 + $0x68] sm:$0xff]  ;;  %v273_v25 = vld [vmem:[#allocation8 + $0x60] sm:$0xff]  ;;  %v272_v26 = vld [vmem:[#allocation8 + $0x58] sm:$0xff]  ;;  %p593_p10 = pnand %p592_p9, %p586_p6 }
  0x3c   :  { %422 = vmatpush3.msra.mxu0 %v81_v7  ;;  %433 = vmatpush3.msra.mxu1 %v179_v9  ;;  %v271_v27 = vld [vmem:[#allocation8 + $0x50] sm:$0xff]  ;;  %v270_v28 = vld [vmem:[#allocation8 + $0x48] sm:$0xff]  ;;  %v269_v29 = vld [vmem:[#allocation8 + $0x40] sm:$0xff] }
  0x3d   :  { %424 = vmatmul.mubr.msk.f32.vlgmr.msra.gmra.mxu0 %vm92_vm1, %v80_v8  ;;  %434 = vmatprep.subr.mxu1 %v619_v0  ;;  %v268_v30 = vld [vmem:[#allocation8 + $0x38] sm:$0xff]  ;;  %v267_v31 = vld [vmem:[#allocation8 + $0x30] sm:$0xff]  ;;  %v266_v32 = vld [vmem:[#allocation8 + $0x28] sm:$0xff] }
  0x3e   :  { %461 = vmatprep.subr.mxu0 %v619_v0  ;;  %435 = vmatpush3.msra.mxu1 %v178_v10  ;;  %v265_v33 = vld [vmem:[#allocation8 + $0x20] sm:$0xff]  ;;  %v264_v34 = vld [vmem:[#allocation8 + $0x18] sm:$0xff]  ;;  %v263_v40 = vld [vmem:[#allocation8 + $0x10] sm:$0xff] }
  0x3f   :  { %493 = vmatprep.mubr.msk.f32.mxu0 %vm620_vm0, %v619_v0  ;;  %436 = vmatprep.subr.mxu1 %v619_v0  ;;  %v372_v35 = vld [vmem:[%s739_s2] ss:$0 sm:$0xff]  ;;  %v262_v41 = vld [vmem:[#allocation8 + $0x8] sm:$0xff]  ;;  %v261_v42 = vld [vmem:[#allocation8] sm:$0xff] }
  0x40   :  { %437 = vmatpush3.msra.mxu1 %v177_v11  ;;  %462 = vmatpush3.msra.mxu0 %v276_v22  ;;  %v374_v43 = vld [vmem:[%s741_s4] ss:$0 sm:$0xff] }
  0x41   :  { %438 = vmatprep.subr.mxu1 %v619_v0  ;;  %463 = vmatprep.subr.mxu0 %v619_v0  ;;  %v375_v48 = vld [vmem:[%s743_s6] ss:$0 sm:$0xff] }
  0x42   :  { %439 = vmatpush3.msra.mxu1 %v176_v12  ;;  %464 = vmatpush3.msra.mxu0 %v275_v23 }
  0x43   :  { %440 = vmatprep.subr.mxu1 %v619_v0  ;;  %465 = vmatprep.subr.mxu0 %v619_v0 }
  0x44   :  { %441 = vmatpush3.msra.mxu1 %v175_v13  ;;  %466 = vmatpush3.msra.mxu0 %v274_v24 }
  0x45   :  { %442 = vmatprep.subr.mxu1 %v619_v0  ;;  %467 = vmatprep.subr.mxu0 %v619_v0 }
  0x46   :  { %443 = vmatpush3.msra.mxu1 %v174_v14  ;;  %468 = vmatpush3.msra.mxu0 %v273_v25 }
  0x47   :  { %444 = vmatprep.subr.mxu1 %v619_v0  ;;  %469 = vmatprep.subr.mxu0 %v619_v0 }
  0x48   :  { %445 = vmatpush3.msra.mxu1 %v173_v15  ;;  %470 = vmatpush3.msra.mxu0 %v272_v26 }
  0x49   :  { %446 = vmatprep.subr.mxu1 %v619_v0  ;;  %471 = vmatprep.subr.mxu0 %v619_v0 }
  0x4a   :  { %447 = vmatpush3.msra.mxu1 %v172_v16  ;;  %472 = vmatpush3.msra.mxu0 %v271_v27 }
  0x4b   :  { %448 = vmatprep.subr.mxu1 %v619_v0  ;;  %473 = vmatprep.subr.mxu0 %v619_v0 }
  0x4c   :  { %449 = vmatpush3.msra.mxu1 %v171_v17  ;;  %474 = vmatpush3.msra.mxu0 %v270_v28 }
  0x4d   :  { %450 = vmatprep.subr.mxu1 %v619_v0  ;;  %475 = vmatprep.subr.mxu0 %v619_v0 }
  0x4e   :  { %451 = vmatpush3.msra.mxu1 %v170_v18  ;;  %476 = vmatpush3.msra.mxu0 %v269_v29 }
  0x4f   :  { %452 = vmatprep.subr.mxu1 %v619_v0  ;;  %477 = vmatprep.subr.mxu0 %v619_v0 }
  0x50   :  { %453 = vmatpush3.msra.mxu1 %v169_v19  ;;  %478 = vmatpush3.msra.mxu0 %v268_v30 }
  0x51   :  { %454 = vmatprep.subr.mxu1 %v619_v0  ;;  %479 = vmatprep.subr.mxu0 %v619_v0 }
  0x52   :  { %455 = vmatpush3.msra.mxu1 %v168_v20  ;;  %480 = vmatpush3.msra.mxu0 %v267_v31 }
  0x53   :  { %456 = vmatprep.subr.mxu1 %v619_v0  ;;  %481 = vmatprep.subr.mxu0 %v619_v0 }
  0x54   :  { %457 = vmatpush3.msra.mxu1 %v167_v21  ;;  %482 = vmatpush3.msra.mxu0 %v266_v32 }
  0x55   :  { %483 = vmatprep.subr.mxu0 %v619_v0 }
  0x56   :  { %484 = vmatpush3.msra.mxu0 %v265_v33 }
  0x57   :  { %485 = vmatprep.subr.mxu0 %v619_v0 }
  0x58   :  { %486 = vmatpush3.msra.mxu0 %v264_v34 }
  0x59   :  { %487 = vmatprep.subr.mxu0 %v619_v0 }
  0x5a   :  { %488 = vmatpush3.msra.mxu0 %v263_v40 }
  0x5b   :  { %489 = vmatprep.subr.mxu0 %v619_v0 }
  0x5c   :  { %490 = vmatpush3.msra.mxu0 %v262_v41 }
  0x5d   :  { %491 = vmatprep.subr.mxu0 %v619_v0 }
  0x5e   :  { %492 = vmatpush3.msra.mxu0 %v261_v42 }
  0xfd   :  { %v162_v36 = vpop.f32.mrf.mxu0 }
  0xfe   :  { %v163_v37 = vadd.f32 %v372_v35, %v162_v36 }
  0xff   :  { %v425_v38 = vpop.f32.mrf.mxu0 }
 0x100   :  { %v166_v39 = vmax.f32 %v163_v37, 0.0 }
 0x102   :  { %459 = vmatmul.mubr.f32.vlgmr.msra.gmra.mxu1 %v166_v39 }
 0x1c2   :  { %v256_v44 = vpop.f32.mrf.mxu1 }
 0x1c3   :  { %v257_v45 = vadd.f32 %v374_v43, %v256_v44 }
 0x1c4   :  { %v460_v46 = vpop.f32.mrf.mxu1 }
 0x1c5   :  { %v260_v47 = vmax.f32 %v257_v45, 0.0 }
 0x1c7   :  { %494 = vmatmul.mubr.f32.vlgmr.msra.gmra.mxu0 %v260_v47 }
 0x287   :  { %v350_v49 = vpop.f32.mrf.mxu0 }
 0x288   :  { %v351_v50 = vadd.f32 %v375_v48, %v350_v49 }
 0x289   :  { %v495_v51 = vpop.f32.mrf.mxu0 }
 0x28a   :  { %354 = vst [vmem:[#allocation10] sm:$0xff] %v351_v50 }
 0x28b   :  { %596 = shalt.err (!%p593_p10)
}
 0x28c   :  { %364 = dma.vmem_to_hbm [thread:$0]  %s362_s25, 128, %s744_s7, [#allocation4]  }
 0x28d   :  { %611 = dma.done.wait [#allocation4], 128  }
 0x28e   :  { %612 = vsyncadd [#allocation4], 4294967168 }
 0x28f   :  { %368 = vsyncpa [#allocation3], 1 }
 0x290   :  { %369 = vsyncpa [#allocation6], 1 }
 0x291   :  { %370 = vsyncpa [#allocation9], 1 }
 0x292   :  { %371 = vsyncpa [#allocation4], 1 }

</bundles_post_ra>
